<compile_context>
chip_gen: v7x
topology: tpu7x:2x2x1
jax: 0.10.0
libtpu: 0.0.40
codegen_flags: <defaults>
</compile_context>

<pallas_src>
import math
from functools import partial

import jax
import jax.numpy as jnp
from jax.experimental import pallas as pl
from jax.experimental.pallas import tpu as pltpu

_MIB = 1024 * 1024
_ROW_GRANULE = 32   # multiple of 32 rows satisfies every dtype's min sublane tile
_LANE = 128


def _round_up(a, b):
    return ((a + b - 1) // b) * b


def _cdiv(a, b):
    return (a + b - 1) // b


# ------------------------------------------------------------------ kernels --

def _scaled_step_mask_kernel(x_ref, mask_ref, o_ref, *, scale, threshold, masked_val):
    x = x_ref[...]
    m = mask_ref[...]

    if m.dtype == jnp.bool_:
        m_nonzero = m
        sum_dtype = jnp.int32
    else:
        m_nonzero = m != 0
        sum_dtype = jnp.int32 if jnp.issubdtype(m.dtype, jnp.integer) else jnp.float32

    # fixed_output = mask.sum(-1) == 1 ; non-"fixed" rows drop their mask.
    row_sum = jnp.sum(m.astype(sum_dtype), axis=-1, keepdims=True)
    m_eff = m_nonzero & (row_sum == jnp.asarray(1, sum_dtype))

    # masked_fill(x, m_eff, masked_val) followed by `x_ > threshold` collapses
    # into a predicate merge because masked_val / threshold are trace-time consts.
    step = x > jnp.asarray(threshold, dtype=x.dtype)
    if float(masked_val) > float(threshold):
        pred = step | m_eff
    else:
        pred = step & jnp.logical_not(m_eff)

    out = jnp.where(pred,
                    jnp.asarray(scale, dtype=o_ref.dtype),
                    jnp.asarray(0, dtype=o_ref.dtype))
    # torch: scale * relu(sign(NaN)) == NaN for unmasked NaN inputs.
    out = jnp.where(jnp.isnan(x) & jnp.logical_not(m_eff),
                    jnp.asarray(jnp.nan, dtype=o_ref.dtype), out)
    o_ref[...] = out


def _scaled_step_nomask_kernel(x_ref, o_ref, *, scale, threshold):
    x = x_ref[...]
    out = jnp.where(x > jnp.asarray(threshold, dtype=x.dtype),
                    jnp.asarray(scale, dtype=o_ref.dtype),
                    jnp.asarray(0, dtype=o_ref.dtype))
    out = jnp.where(jnp.isnan(x), jnp.asarray(jnp.nan, dtype=o_ref.dtype), out)
    o_ref[...] = out


# ------------------------------------------------------------------ tiling ---

def _device_params():
    """(target bytes of x per tile buffer, #TensorCores, scoped-VMEM cap)."""
    kind = ""
    try:
        kind = jax.devices()[0].device_kind.lower()
    except Exception:
        pass
    if "v7" in kind:
        # 64 MiB physical VMEM shared by 2 TCs, 3.2 TB/s HBM: big tiles, even grid.
        return 8 * _MIB, 2, 48 * _MIB
    # single-TC v5e / v6e (128 MiB physical VMEM) and conservative default.
    return 4 * _MIB, 1, 64 * _MIB


def _pick_block_rows(b_rows, lane_pad, x_itemsize, per_elem_bytes,
                     target_x_bytes, num_tc, vmem_cap):
    """Row tile: multiple of 32 (or the full batch), sized to ~target_x_bytes of x
    per buffer, clamped so the double-buffered working set fits the VMEM cap, and
    (on multi-TC chips) shaped toward an even grid with >= 2 steps per core."""
    if b_rows <= _ROW_GRANULE:
        return b_rows                                   # full-dim block
    rows = (target_x_bytes // (x_itemsize * lane_pad)) // _ROW_GRANULE * _ROW_GRANULE
    rows = max(rows, _ROW_GRANULE)
    # Keep double-buffered (x [+ mask] + out) under the scoped-VMEM cap.
    vmem_rows = (vmem_cap - 4 * _MIB) // (2 * per_elem_bytes * lane_pad)
    vmem_rows = max(_ROW_GRANULE, vmem_rows // _ROW_GRANULE * _ROW_GRANULE)
    rows = min(rows, vmem_rows)
    if num_tc >= 2:
        min_steps = 2 * num_tc                          # >= 2 pipelined steps/core
        if b_rows >= min_steps * _ROW_GRANULE:
            cap = max(_ROW_GRANULE,
                      (b_rows // min_steps) // _ROW_GRANULE * _ROW_GRANULE)
            rows = min(rows, cap)
        steps = _cdiv(b_rows, rows)
        if steps > 1 and steps % 2 == 1:                # balance the two cores
            rows = max(_ROW_GRANULE,
                       _round_up(_cdiv(b_rows, steps + 1), _ROW_GRANULE))
    return min(rows, b_rows)


# ------------------------------------------------------------------ wrapper --

def scaled_step(x, mask=None, *, scale=math.pi, threshold=0.0, masked_val=0.0,
                out_dtype=None):
    """Pallas ScaledStep forward.

    x: float array, any rank >= 1 (leading dims flattened into a batch).
    mask: optional bool/int/float array, same shape as x or broadcastable along
          the batch dims (e.g. (N,) or (1, N)).
    out_dtype: optional narrower output dtype (the output is two-valued).
    """
    if x.ndim < 2:
        x = x[None, :]
    out_nd_shape = x.shape
    N = x.shape[-1]
    B = 1
    for d in x.shape[:-1]:
        B *= d
    x2 = x.reshape(B, N)
    out_dtype = x2.dtype if out_dtype is None else jnp.dtype(out_dtype)

    # Mask plumbing: never materialize a broadcast, never convert dtype.
    mask2 = None
    mask_rows = 0
    if mask is not None:
        msize = 1
        for d in mask.shape:
            msize *= d
        if mask.shape == x.shape or msize == B * N:
            mask2, mask_rows = mask.reshape(B, N), B
        elif msize == N:
            mask2, mask_rows = mask.reshape(1, N), 1          # row-broadcast mask
        else:  # rare broadcast pattern (e.g. (B, 1)); materialize as last resort
            mask2, mask_rows = jnp.broadcast_to(mask, x.shape).reshape(B, N), B

    lane_pad = _round_up(N, _LANE)
    per_elem = x2.dtype.itemsize + out_dtype.itemsize
    if mask2 is not None and mask_rows == B:
        per_elem += mask2.dtype.itemsize

    target_x_bytes, num_tc, vmem_cap = _device_params()
    tb = _pick_block_rows(B, lane_pad, x2.dtype.itemsize, per_elem,
                          target_x_bytes, num_tc, vmem_cap)
    grid = (pl.cdiv(B, tb),)   # ragged last block handled by Pallas (no jnp.pad)

    working = 2 * per_elem * tb * lane_pad
    vmem_limit = int(min(max(working + 4 * _MIB, 32 * _MIB), vmem_cap))
    cparams = pltpu.CompilerParams(
        dimension_semantics=("parallel",),
        vmem_limit_bytes=vmem_limit,
    )

    row_spec = pl.BlockSpec((tb, N), lambda i: (i, 0))
    out_struct = jax.ShapeDtypeStruct((B, N), out_dtype)

    if mask2 is None:
        out = pl.pallas_call(
            partial(_scaled_step_nomask_kernel, scale=scale, threshold=threshold),
            out_shape=out_struct,
            grid_spec=pltpu.PrefetchScalarGridSpec(
                num_scalar_prefetch=0, grid=grid,
                in_specs=[row_spec], out_specs=row_spec),
            compiler_params=cparams,
        )(x2)
    else:
        if mask_rows == B:
            mask_spec = row_spec
        else:  # the same (1, N) VMEM tile is re-used every grid step
            mask_spec = pl.BlockSpec((1, N), lambda i: (0, 0))
        out = pl.pallas_call(
            partial(_scaled_step_mask_kernel, scale=scale, threshold=threshold,
                    masked_val=masked_val),
            out_shape=out_struct,
            grid_spec=pltpu.PrefetchScalarGridSpec(
                num_scalar_prefetch=0, grid=grid,
                in_specs=[row_spec, mask_spec], out_specs=row_spec),
            compiler_params=cparams,
        )(x2, mask2)

    return out.reshape(out_nd_shape)


# ---------------------------------------------------------------- reference --

def _reference(x, mask, scale=math.pi, threshold=0.0, masked_val=0.0):
    """Pure-JAX mirror of the PyTorch module."""
    if mask is not None:
        sum_dtype = (jnp.int32 if (mask.dtype == jnp.bool_
                                   or jnp.issubdtype(mask.dtype, jnp.integer))
                     else jnp.float32)
        fixed = jnp.sum(mask.astype(sum_dtype), axis=-1, keepdims=True) == 1
        m_eff = (mask != 0) & fixed
        x = jnp.where(jnp.broadcast_to(m_eff, x.shape),
                      jnp.asarray(masked_val, x.dtype), x)
    if x.ndim < 2:
        x = x[None, :]
    return (scale * jnp.maximum(jnp.sign(x - jnp.asarray(threshold, x.dtype)), 0.0)
            ).astype(x.dtype)


if __name__ == "__main__":
    key = jax.random.PRNGKey(0)
    kx, km, kx2 = jax.random.split(key, 3)

    # Case 1: aligned shape, full-shape bool mask (half the rows are "fixed").
    B, N = 8, 128
    x = jax.random.normal(kx, (B, N), dtype=jnp.float32)
    mask = jax.random.bernoulli(km, 0.3, (B, N))
    one_hot_rows = jnp.zeros((B // 2, N), dtype=bool).at[:, 3].set(True)
    mask = mask.at[: B // 2].set(one_hot_rows)

    out = scaled_step(x, mask)
    jax.block_until_ready(out)
    assert out.shape == x.shape
    assert jnp.allclose(out, _reference(x, mask)), "mismatch (masked, aligned)"

    # Case 2: no mask.
    out_nomask = scaled_step(x, None)
    jax.block_until_ready(out_nomask)
    assert jnp.allclose(out_nomask, _reference(x, None)), "mismatch (no mask)"

    # Case 3: unaligned shape (ragged row/lane blocks) + row-broadcast bool mask.
    x3 = jax.random.normal(kx2, (2, 3, 96), dtype=jnp.float32)
    row_mask = jnp.zeros((96,), dtype=bool).at[5].set(True)   # sum == 1 -> fixed
    out3 = scaled_step(x3, row_mask)
    jax.block_until_ready(out3)
    assert out3.shape == x3.shape
    assert jnp.allclose(out3, _reference(x3, row_mask)), "mismatch (broadcast mask)"

    print("KERNEL_OK")
</pallas_src>

<mosaic_0001>
module attributes {stable_mosaic.version = 11 : i64} {
  func.func @_scaled_step_mask_kernel(%arg0: i32, %arg1: memref<8x128xf32, #tpu.memory_space<vmem>>, %arg2: memref<8x128xi32, #tpu.memory_space<vmem>>, %arg3: memref<8x128xf32, #tpu.memory_space<vmem>>) attributes {dimension_semantics = [#tpu.dimension_semantics<parallel>], iteration_bounds = array<i64: 1>, scalar_prefetch = 0 : i64, scratch_operands = 0 : i64, tpu.core_type = #tpu.core_type<tc>, window_params = [{transform_indices = @transform_0, window_bounds = array<i64: 8, 128>}, {transform_indices = @transform_1, window_bounds = array<i64: 8, 128>}, {transform_indices = @transform_2, window_bounds = array<i64: 8, 128>}]} {
    %c0 = arith.constant 0 : index
    %c0_0 = arith.constant 0 : index
    %0 = vector.load %arg1[%c0, %c0_0] : memref<8x128xf32, #tpu.memory_space<vmem>>, vector<8x128xf32>
    %c0_1 = arith.constant 0 : index
    %c0_2 = arith.constant 0 : index
    %1 = vector.load %arg2[%c0_1, %c0_2] : memref<8x128xi32, #tpu.memory_space<vmem>>, vector<8x128xi32>
    %cst = arith.constant dense<0> : vector<8x128xi32>
    %2 = arith.cmpi ne, %1, %cst : vector<8x128xi32>
    %3 = arith.extui %2 : vector<8x128xi1> to vector<8x128xi32>
    %cst_3 = arith.constant dense<0> : vector<8xi32>
    %4 = vector.multi_reduction <add>, %3, %cst_3 [1] : vector<8x128xi32> to vector<8xi32>
    %5 = vector.shape_cast %4 : vector<8xi32> to vector<8x1xi32>
    %c1_i32 = arith.constant 1 : i32
    %6 = vector.broadcast %c1_i32 : i32 to vector<8x1xi32>
    %7 = arith.cmpi eq, %5, %6 : vector<8x1xi32>
    %8 = vector.broadcast %7 : vector<8x1xi1> to vector<8x128xi1>
    %9 = arith.andi %2, %8 : vector<8x128xi1>
    %cst_4 = arith.constant 0.000000e+00 : f32
    %10 = vector.broadcast %cst_4 : f32 to vector<8x128xf32>
    %11 = arith.cmpf ogt, %0, %10 : vector<8x128xf32>
    %cst_5 = arith.constant dense<true> : vector<8x128xi1>
    %12 = arith.xori %9, %cst_5 : vector<8x128xi1>
    %13 = arith.andi %11, %12 : vector<8x128xi1>
    %cst_6 = arith.constant 3.14159274 : f32
    %cst_7 = arith.constant 0.000000e+00 : f32
    %14 = vector.broadcast %cst_6 : f32 to vector<8x128xf32>
    %15 = vector.broadcast %cst_7 : f32 to vector<8x128xf32>
    %16 = arith.select %13, %14, %15 : vector<8x128xi1>, vector<8x128xf32>
    %17 = arith.cmpf one, %0, %0 : vector<8x128xf32>
    %cst_8 = arith.constant dense<true> : vector<8x128xi1>
    %18 = arith.xori %9, %cst_8 : vector<8x128xi1>
    %19 = arith.andi %17, %18 : vector<8x128xi1>
    %cst_9 = arith.constant 0x7FC00000 : f32
    %20 = vector.broadcast %cst_9 : f32 to vector<8x128xf32>
    %21 = arith.select %19, %20, %16 : vector<8x128xi1>, vector<8x128xf32>
    %c0_10 = arith.constant 0 : index
    %c0_11 = arith.constant 0 : index
    %22 = vector.load %arg3[%c0_10, %c0_11] : memref<8x128xf32, #tpu.memory_space<vmem>>, vector<8x128xf32>
    tpu.vector_store %arg3[%c0_10, %c0_11], %21 {strides = array<i32>} : memref<8x128xf32, #tpu.memory_space<vmem>>, vector<8x128xf32>,
    return
  }
  func.func @transform_0(%arg0: i32) -> (i32, i32) {
    %c0_i32 = arith.constant 0 : i32
    %c0_i32_0 = arith.constant 0 : i32
    return %arg0, %c0_i32 : i32, i32
  }
  func.func @transform_1(%arg0: i32) -> (i32, i32) {
    %c0_i32 = arith.constant 0 : i32
    %c0_i32_0 = arith.constant 0 : i32
    return %arg0, %c0_i32 : i32, i32
  }
  func.func @transform_2(%arg0: i32) -> (i32, i32) {
    %c0_i32 = arith.constant 0 : i32
    %c0_i32_0 = arith.constant 0 : i32
    return %arg0, %c0_i32 : i32, i32
  }
}

</mosaic_0001>

<bundles_post_ra>
// kernel: tpu_custom_call.1
= control target key start
LH: loop header
LB: loop body
LE: loop exit
PB: predicated region body
PF: predicated region fallthrough
CT: control target
= control target key end

     0   :  { %s121_s0 = inlined_call_operand.vmem [shape: f32[8,128], index: 0, kind: input, shape index: {}]   ;;  %s122_s1 = inlined_call_operand.vmem [shape: s32[8,128], index: 1, kind: input, shape index: {}]   ;;  %s123_s2 = inlined_call_operand.hbm [shape: f32[8,128], index: 2, kind: output, shape index: {}]  }
   0x1   :  { %v13_v0 = vld [vmem:[%s122_s1] sm:$0xff] }
   0x2   :  { %7 = vsyncpa [#allocation3], 0  ;;  %vm14_vm0 = vcmp.ne.s32.totalorder %v13_v0, 0  ;;  %v82_v1 = vmov 0   ;;  %v12_v12 = vld [vmem:[%s121_s0] sm:$0xff]  ;;  %s83_s1 = smov [#allocation2]  }
   0x3   :  { %v15_v2 = vsel %vm14_vm0, 1, %v82_v1  ;;  %vm32_vm2 = vcmp.gt.f32.partialorder %v12_v12, 0.0  ;;  %vm36_vm4 = vcmp.ne.f32.partialorder %v12_v12, %v12_v12  ;;  %s46_s13 = sshll.u32 %s83_s1, 4  ;;  %vm84_vm5 = vmmov 1   ;;  %s47_s13 = int_to_ptr.vmem [resolvable:$true] %s46_s13 }
   0x4   :  { %v17_v3 = vshrl.u32 %v15_v2, 16  ;;  %v16_v4 = vand.u32 65535, %v15_v2  ;;  %v85_v14 = vmov 0.0   ;;  %s58_s14 = scalar_lea.vmem %s47_s13, 128  ;;  %p63_p1 = scmp.lt.s32.totalorder %s47_s13, %s47_s13 }
   0x5   :  { %p59_p0 = scmp.ne.s32.totalorder %s47_s13, %s58_s14  ;;  %p64_p2 = scmp.lt.s32.totalorder %s58_s14, %s58_s14 }
   0x6   :  { %v19_v5 = vcvt.s32.f32 %v17_v3  ;;  %v18_v6 = vcvt.s32.f32 %v16_v4 }
   0x7   :  { %p65_p3 = por %p64_p2, %p63_p1 }
   0x8   :  { %22 = vadd.xlane.f32.xlu0 %v19_v5 }
   0x9   :  { %p66_p4 = pnand %p65_p3, %p59_p0 }
   0xc   :  { %20 = vadd.xlane.f32.xlu0 %v18_v6 }
  0x95   :  { %v23_v7 = vpop.xlane.xlu0 %22 }
  0x96   :  { %v25_v8 = vcvt.f32.s32 %v23_v7 }
  0x98   :  { %v26_v10 = vshll.u32 %v25_v8, 16 }
  0x99   :  { %v21_v9 = vpop.xlane.xlu0 %20 }
  0x9a   :  { %v24_v11 = vcvt.f32.s32 %v21_v9 }
  0x9c   :  { %v27_v13 = vadd.s32 %v26_v10, %v24_v11 }
  0x9e   :  { %vm28_vm1 = vcmp.eq.s32.totalorder %v27_v13, 1 }
  0x9f   :  { %vm31_vm3 = vmand %vm14_vm0, %vm28_vm1 }
  0xa0   :  { %vm33_vm6 = vmxor %vm31_vm3, %vm84_vm5 }
  0xa1   :  { %vm34_vm7 = vmand %vm32_vm2, %vm33_vm6 }
  0xa2   :  { %v35_v15 = vsel %vm34_vm7, 3.1415927, %v85_v14  ;;  %vm37_vm8 = vmand %vm36_vm4, %vm33_vm6 }
  0xa3   :  { %v38_v16 = vsel %vm37_vm8, nan, %v35_v15 }
  0xa4   :  { %39 = vst [vmem:[#allocation2] sm:$0xff] %v38_v16 }
  0xa5   :  { %69 = shalt.err (!%p66_p4)
}
  0xa6   :  { %s70_s16 = scalar_lea.hbm %s123_s2, 128 }
  0xa7   :  { %p71_p5 = scmp.ne.s32.totalorder %s123_s2, %s70_s16  ;;  %p74_p6 = scmp.lt.u32.totalorder %s70_s16, %s123_s2 }
  0xa9   :  { %p76_p7 = pnand %p74_p6, %p71_p5 }
  0xab   :  { %79 = shalt.err (!%p76_p7)
}
  0xac   :  { %49 = dma.vmem_to_hbm [thread:$0]  %s47_s13, 128, %s123_s2, [#allocation3]  }
  0xad   :  { %80 = dma.done.wait [#allocation3], 128  }
  0xae   :  { %81 = vsyncadd [#allocation3], 4294967168 }
  0xaf   :  { %53 = vsyncpa [#allocation3], 1 }

</bundles_post_ra>
